<compile_context>
chip_gen: v6e
topology: v6e:2x2x1
jax: 0.10.0
libtpu: 0.0.40
codegen_flags: <defaults>
</compile_context>

<pallas_src>
import functools
import math

import jax
import jax.numpy as jnp
from jax.experimental import pallas as pl
from jax.experimental.pallas import tpu as pltpu


def _round_up(v, m):
    return (v + m - 1) // m * m


def _softmax_layer_kernel(x_ref, w_ref, b_ref, y_ref, nll_ref, *, n_valid):
    i = pl.program_id(0)
    tb = x_ref.shape[0]

    # Linear layer on the MXU: bf16 operands, f32 accumulation.
    logits = jnp.dot(x_ref[...], w_ref[...],
                     preferred_element_type=jnp.float32) + b_ref[...]      # (TB, Cp)

    # Numerically-stable logsumexp over classes; padded class columns carry a
    # -1e30 bias so they never win the max and vanish in the exp.
    m = jnp.max(logits, axis=-1, keepdims=True)                            # (TB, 1)
    lse = m + jnp.log(jnp.sum(jnp.exp(logits - m), axis=-1, keepdims=True))

    # Target-class logit via one-hot mask (no dynamic gather on TPU).
    y = y_ref[...]                                                         # (TB, 1)
    cls = jax.lax.broadcasted_iota(jnp.int32, logits.shape, 1)             # (TB, Cp)
    tgt = jnp.sum(jnp.where(cls == y, logits, 0.0), axis=-1, keepdims=True)

    # Zero the contribution of padded batch rows.
    row = jax.lax.broadcasted_iota(jnp.int32, (tb, 1), 0) + i * tb
    nll_ref[...] = jnp.where(row < n_valid, lse - tgt, 0.0)


def softmax_layer_forward(x, y, weight, bias, *, tile_batch=128,
                          compute_dtype=jnp.bfloat16):
    """x: (N, D) f32, y: (N,) int, weight: (C, D) f32, bias: (C,) f32 -> scalar f32."""
    n, d = x.shape
    c = weight.shape[0]

    # Batch tile: main tuning knob (multiple of 8, clamped for small N).
    tb = _round_up(min(tile_batch, _round_up(n, 8)), 8)
    n_pad = _round_up(n, tb)
    # Lane-dense class axis (multiple of 128).
    c_pad = _round_up(max(c, 128), 128)

    # Host-side padding / casting (bf16 operands, f32 bias & accumulation).
    x_p = jnp.zeros((n_pad, d), compute_dtype).at[:n].set(x.astype(compute_dtype))
    w_t = jnp.zeros((d, c_pad), compute_dtype).at[:, :c].set(
        weight.T.astype(compute_dtype))
    b_p = jnp.full((1, c_pad), -1e30, jnp.float32).at[0, :c].set(
        bias.astype(jnp.float32))
    y_p = jnp.zeros((n_pad, 1), jnp.int32).at[:n, 0].set(y.astype(jnp.int32))

    kernel = functools.partial(_softmax_layer_kernel, n_valid=n)
    grid = (n_pad // tb,)

    nll = pl.pallas_call(
        kernel,
        out_shape=jax.ShapeDtypeStruct((n_pad, 1), jnp.float32),
        grid_spec=pltpu.PrefetchScalarGridSpec(
            num_scalar_prefetch=0,
            grid=grid,
            in_specs=[
                pl.BlockSpec((tb, d), lambda i: (i, 0)),       # x tile (streamed)
                pl.BlockSpec((d, c_pad), lambda i: (0, 0)),    # weight (resident)
                pl.BlockSpec((1, c_pad), lambda i: (0, 0)),    # bias (resident)
                pl.BlockSpec((tb, 1), lambda i: (i, 0)),       # labels (streamed)
            ],
            out_specs=pl.BlockSpec((tb, 1), lambda i: (i, 0)),  # per-row NLL
        ),
        compiler_params=pltpu.CompilerParams(
            dimension_semantics=("parallel",),                  # megacore-shardable
        ),
    )(x_p, w_t, b_p, y_p)

    # CrossEntropyLoss(size_average=False): plain sum of per-row NLL.
    return jnp.sum(nll)


def _reference(x, y, weight, bias, compute_dtype=jnp.float32):
    logits = jnp.dot(x.astype(compute_dtype), weight.T.astype(compute_dtype),
                     preferred_element_type=jnp.float32) + bias.astype(jnp.float32)
    lse = jax.scipy.special.logsumexp(logits, axis=-1)
    tgt = jnp.take_along_axis(logits, y[:, None], axis=-1)[:, 0]
    return jnp.sum(lse - tgt)


if __name__ == "__main__":
    # Small shapes consistent with the module: N tokens, hidden=32, n_class=16.
    N, D, C = 16, 32, 16

    key = jax.random.PRNGKey(0)
    kx, ky, kw, kb = jax.random.split(key, 4)

    x = jax.random.normal(kx, (N, D), dtype=jnp.float32)
    y = jax.random.randint(ky, (N,), 0, C, dtype=jnp.int32)

    # Deterministic parameter init (mimics nn.Linear uniform(-1/sqrt(D), 1/sqrt(D))).
    bound = 1.0 / math.sqrt(D)
    weight = jax.random.uniform(kw, (C, D), minval=-bound, maxval=bound,
                                dtype=jnp.float32)
    bias = jax.random.uniform(kb, (C,), minval=-bound, maxval=bound,
                              dtype=jnp.float32)

    loss = softmax_layer_forward(x, y, weight, bias, tile_batch=128)
    loss = jax.block_until_ready(loss)

    # Same-precision (bf16 matmul, f32 accumulate) reference: tight-ish tolerance.
    ref_bf16 = _reference(x, y, weight, bias, compute_dtype=jnp.bfloat16)
    # Full-f32 reference: loose tolerance (bounds the bf16 operand-cast error).
    ref_f32 = _reference(x, y, weight, bias, compute_dtype=jnp.float32)

    assert jnp.allclose(loss, ref_bf16, rtol=1e-3, atol=1e-3), (loss, ref_bf16)
    assert jnp.allclose(loss, ref_f32, rtol=2e-2, atol=2e-2), (loss, ref_f32)

    print("KERNEL_OK")
</pallas_src>

<mosaic_0001>
module attributes {stable_mosaic.version = 11 : i64} {
  func.func @_softmax_layer_kernel(%arg0: i32, %arg1: memref<16x32xbf16, #tpu.memory_space<vmem>>, %arg2: memref<32x128xbf16, #tpu.memory_space<vmem>>, %arg3: memref<1x128xf32, #tpu.memory_space<vmem>>, %arg4: memref<16x1xi32, #tpu.memory_space<vmem>>, %arg5: memref<16x1xf32, #tpu.memory_space<vmem>>) attributes {dimension_semantics = [#tpu.dimension_semantics<parallel>], iteration_bounds = array<i64: 1>, scalar_prefetch = 0 : i64, scratch_operands = 0 : i64, tpu.core_type = #tpu.core_type<tc>, window_params = [{transform_indices = @transform_0, window_bounds = array<i64: 16, 32>}, {pipeline_mode = #tpu.pipeline_mode<synchronous>, transform_indices = @transform_1, window_bounds = array<i64: 32, 128>}, {pipeline_mode = #tpu.pipeline_mode<synchronous>, transform_indices = @transform_2, window_bounds = array<i64: 1, 128>}, {transform_indices = @transform_3, window_bounds = array<i64: 16, 1>}, {transform_indices = @transform_4, window_bounds = array<i64: 16, 1>}]} {
    %c0 = arith.constant 0 : index
    %c0_0 = arith.constant 0 : index
    %0 = vector.load %arg1[%c0, %c0_0] : memref<16x32xbf16, #tpu.memory_space<vmem>>, vector<16x32xbf16>
    %c0_1 = arith.constant 0 : index
    %c0_2 = arith.constant 0 : index
    %1 = vector.load %arg2[%c0_1, %c0_2] : memref<32x128xbf16, #tpu.memory_space<vmem>>, vector<32x128xbf16>
    %cst = arith.constant dense<0.000000e+00> : vector<16x128xf32>
    %2 = tpu.matmul %0, %1, %cst {dimension_numbers = #tpu.dot_dimension_numbers<[1], [0], [0], [1], [0, 0, 1, 1], [], []>} : vector<16x32xbf16>, vector<32x128xbf16>, vector<16x128xf32> -> vector<16x128xf32>
    %c0_3 = arith.constant 0 : index
    %c0_4 = arith.constant 0 : index
    %3 = vector.load %arg3[%c0_3, %c0_4] : memref<1x128xf32, #tpu.memory_space<vmem>>, vector<1x128xf32>
    %4 = vector.broadcast %3 : vector<1x128xf32> to vector<16x128xf32>
    %5 = arith.addf %2, %4 : vector<16x128xf32>
    %cst_5 = arith.constant dense<0xFF800000> : vector<16xf32>
    %6 = vector.multi_reduction <maximumf>, %5, %cst_5 [1] : vector<16x128xf32> to vector<16xf32>
    %7 = vector.shape_cast %6 : vector<16xf32> to vector<16x1xf32>
    %8 = vector.broadcast %7 : vector<16x1xf32> to vector<16x128xf32>
    %9 = arith.subf %5, %8 : vector<16x128xf32>
    %10 = math.exp %9 : vector<16x128xf32>
    %cst_6 = arith.constant dense<0.000000e+00> : vector<16xf32>
    %11 = vector.multi_reduction <add>, %10, %cst_6 [1] : vector<16x128xf32> to vector<16xf32>
    %12 = vector.shape_cast %11 : vector<16xf32> to vector<16x1xf32>
    %13 = math.log %12 : vector<16x1xf32>
    %14 = arith.addf %7, %13 : vector<16x1xf32>
    %c0_7 = arith.constant 0 : index
    %c0_8 = arith.constant 0 : index
    %15 = vector.load %arg4[%c0_7, %c0_8] : memref<16x1xi32, #tpu.memory_space<vmem>>, vector<16x1xi32>
    %16 = tpu.iota {dimensions = array<i32: 1>} : vector<16x128xi32>
    %17 = vector.broadcast %15 : vector<16x1xi32> to vector<16x128xi32>
    %18 = arith.cmpi eq, %16, %17 : vector<16x128xi32>
    %cst_9 = arith.constant 0.000000e+00 : f32
    %19 = vector.broadcast %cst_9 : f32 to vector<16x128xf32>
    %20 = arith.select %18, %5, %19 : vector<16x128xi1>, vector<16x128xf32>
    %cst_10 = arith.constant dense<0.000000e+00> : vector<16xf32>
    %21 = vector.multi_reduction <add>, %20, %cst_10 [1] : vector<16x128xf32> to vector<16xf32>
    %22 = vector.shape_cast %21 : vector<16xf32> to vector<16x1xf32>
    %23 = tpu.iota {dimensions = array<i32: 0>} : vector<16x1xi32>
    %c16_i32 = arith.constant 16 : i32
    %24 = arith.muli %arg0, %c16_i32 : i32
    %25 = vector.broadcast %24 : i32 to vector<16x1xi32>
    %26 = arith.addi %23, %25 : vector<16x1xi32>
    %c16_i32_11 = arith.constant 16 : i32
    %27 = vector.broadcast %c16_i32_11 : i32 to vector<16x1xi32>
    %28 = arith.cmpi slt, %26, %27 : vector<16x1xi32>
    %29 = arith.subf %14, %22 : vector<16x1xf32>
    %cst_12 = arith.constant 0.000000e+00 : f32
    %30 = vector.broadcast %cst_12 : f32 to vector<16x1xf32>
    %31 = arith.select %28, %29, %30 : vector<16x1xi1>, vector<16x1xf32>
    %c0_13 = arith.constant 0 : index
    %c0_14 = arith.constant 0 : index
    %32 = vector.load %arg5[%c0_13, %c0_14] : memref<16x1xf32, #tpu.memory_space<vmem>>, vector<16x1xf32>
    tpu.vector_store %arg5[%c0_13, %c0_14], %31 {strides = array<i32>} : memref<16x1xf32, #tpu.memory_space<vmem>>, vector<16x1xf32>,
    return
  }
  func.func @transform_0(%arg0: i32) -> (i32, i32) {
    %c0_i32 = arith.constant 0 : i32
    %c0_i32_0 = arith.constant 0 : i32
    return %arg0, %c0_i32 : i32, i32
  }
  func.func @transform_1(%arg0: i32) -> (i32, i32) {
    %c0_i32 = arith.constant 0 : i32
    %c0_i32_0 = arith.constant 0 : i32
    %c0_i32_1 = arith.constant 0 : i32
    return %c0_i32, %c0_i32_0 : i32, i32
  }
  func.func @transform_2(%arg0: i32) -> (i32, i32) {
    %c0_i32 = arith.constant 0 : i32
    %c0_i32_0 = arith.constant 0 : i32
    %c0_i32_1 = arith.constant 0 : i32
    return %c0_i32, %c0_i32_0 : i32, i32
  }
  func.func @transform_3(%arg0: i32) -> (i32, i32) {
    %c0_i32 = arith.constant 0 : i32
    %c0_i32_0 = arith.constant 0 : i32
    return %arg0, %c0_i32 : i32, i32
  }
  func.func @transform_4(%arg0: i32) -> (i32, i32) {
    %c0_i32 = arith.constant 0 : i32
    %c0_i32_0 = arith.constant 0 : i32
    return %arg0, %c0_i32 : i32, i32
  }
}

</mosaic_0001>

<bundles_post_ra>
// kernel: tpu_custom_call.1
= control target key start
LH: loop header
LB: loop body
LE: loop exit
PB: predicated region body
PF: predicated region fallthrough
CT: control target
= control target key end

     0   :  { %9 = vsyncpa [#allocation3], 0  ;;  %s223_s15 = smov [#allocation2]   ;;  %s278_s0 = inlined_call_operand.hbm [shape: bf16[16,32], index: 0, kind: input, shape index: {}]   ;;  %s279_s1 = inlined_call_operand.vmem [shape: bf16[32,128], index: 1, kind: input, shape index: {}]   ;;  %s280_s2 = inlined_call_operand.vmem [shape: f32[1,128], index: 2, kind: input, shape index: {}]   ;;  %s281_s3 = inlined_call_operand.vmem [shape: s32[16,1], index: 3, kind: input, shape index: {}]   ;;  %s282_s4 = inlined_call_operand.vmem [shape: f32[16,1], index: 4, kind: output, shape index: {}]  }
   0x1   :  { %s15_s16 = sshll.u32 %s223_s15, 4  ;;  %s16_s16 = int_to_ptr.vmem [resolvable:$true] %s15_s16 }
   0x2   :  { %s209_s17 = scalar_lea.vmem %s16_s16, 128  ;;  %p214_p1 = scmp.lt.s32.totalorder %s16_s16, %s16_s16 }
   0x3   :  { %p210_p0 = scmp.ne.s32.totalorder %s16_s16, %s209_s17  ;;  %p215_p2 = scmp.lt.s32.totalorder %s209_s17, %s209_s17 }
   0x5   :  { %p216_p3 = por %p215_p2, %p214_p1 }
   0x7   :  { %p217_p4 = pnand %p216_p3, %p210_p0 }
   0x9   :  { %220 = shalt.err (!%p217_p4)
}
   0xa   :  { %s224_s18 = smov 64   ;;  %s225_s19 = smov 4  }
   0xb   :  { %21 = dma.hbm_to_vmem [thread:$0]  %s278_s0, 128, %s16_s16, [#allocation3], %s224_s18, %s224_s18, %s225_s19  }
   0xc   :  { %221 = dma.done.wait [#allocation3], 128  }
   0xd   :  { %222 = vsyncadd [#allocation3], 4294967168  ;;  %v226_v0 = vmov 0.0   ;;  %vm227_vm0 = vmmov 0   ;;  %v228_v1 = vmov 0   ;;  %v190_v2 = vld [vmem:[%s279_s1 + $0x8] sm:$0xff]   ;;  %v129_v20 = vlaneseq }
   0xe   :  { %174 = vmatprep.subr.bf16.mxu0 %v226_v0  ;;  %178 = vmatprep.mubr.msk.bf16.mxu0 %vm227_vm0, %v226_v0  ;;  %v191_v3 = vld [vmem:[%s279_s1] sm:$0xff]   ;;  %v128_v6 = vld [vmem:[%s281_s3 + $0x8] sm:$0xff]  ;;  %vm62_vm1 = vcmask 261120   ;;  %vm158_vm4 = vcmask 7168  }
   0xf   :  { %188 = vset.pattern.permute.xlu1 %v228_v1  ;;  %189 = vset.pattern.permute.xlu0 %v228_v1  ;;  %v127_v4 = vld [vmem:[%s281_s3] sm:$0xff]  ;;  %v130_v22 = vand.u32 127, %v129_v20 }
  0x10   :  { %175 = vmatpush3.bf16.msra.mxu0 %v190_v2  ;;  %132 = vperm.xlu1 %188, %v127_v4   ;;  %v192_v5 = vld [vmem:[#allocation2] sm:$0xff]  }
  0x11   :  { %176 = vmatprep.subr.bf16.mxu0 %v226_v0  ;;  %v166_v7 = vld [vmem:[%s280_s2] ss:$0 sm:$0xff] }
  0x14   :  { %177 = vmatpush3.bf16.msra.mxu0 %v191_v3  ;;  %135 = vperm.xlu1 %188, %v128_v6  }
  0x17   :  { %179 = vmatmul.mubr.msk.bf16.vlgmr.msra.gmra.mxu0 %vm62_vm1, %v192_v5 }
  0x8b   :  { %v133_v21 = vpop.permute.xlu1 %132 }
  0x8c   :  { %vm137_vm2 = vcmp.eq.s32.totalorder %v130_v22, %v133_v21 }
  0x8f   :  { %v136_v24 = vpop.permute.xlu1 %135 }
  0x90   :  { %vm138_vm3 = vcmp.eq.s32.totalorder %v130_v22, %v136_v24 }
  0xd7   :  { %v100_v8 = vpop.f32.mrf.mxu0 }
  0xd8   :  { %v101_v9 = vadd.f32 %v166_v7, %v100_v8 }
  0xd9   :  { %v180_v10 = vpop.f32.mrf.mxu0 }
  0xda   :  { %107 = vmax.xlane.f32.xlu0 %v101_v9  ;;  %v139_v26 = vsel %vm137_vm2, %v101_v9, 0.0 }
  0xdb   :  { %v103_v11 = vpop.f32.mrf.mxu0 }
  0xdc   :  { %v104_v12 = vadd.f32 %v166_v7, %v103_v11 }
  0xdd   :  { %v181_v13 = vpop.f32.mrf.mxu0 }
  0xde   :  { %109 = vmax.xlane.f32.xlu0 %v104_v12  ;;  %v140_v27 = vsel %vm138_vm3, %v104_v12, 0.0 }
 0x163   :  { %v108_v14 = vpop.xlane.xlu0 %107 }
 0x164   :  { %v111_v15 = vsub.f32 %v101_v9, %v108_v14 }
 0x166   :  { %v113_v16 = vmul.f32 1.442695, %v111_v15 }
 0x167   :  { %v110_v17 = vpop.xlane.xlu0 %109 }
 0x168   :  { %193 = vpow2.f32 %v113_v16  ;;  %v112_v18 = vsub.f32 %v104_v12, %v110_v17 }
 0x16a   :  { %v115_v19 = vmul.f32 1.442695, %v112_v18 }
 0x16c   :  { %195 = vpow2.f32 %v115_v19 }
 0x175   :  { %v194_v23 = vpop.eup %193 }
 0x176   :  { %117 = vadd.xlane.f32.xlu0 %v194_v23 }
 0x179   :  { %v196_v25 = vpop.eup %195 }
 0x17a   :  { %141 = vadd.xlane.f32.xlu0 %v139_v26  ;;  %119 = vadd.xlane.f32.xlu1 %v196_v25 }
 0x17e   :  { %143 = vadd.xlane.f32.xlu0 %v140_v27 }
 0x1ff   :  { %v118_v28 = vpop.xlane.xlu0 %117 }
 0x200   :  { %197 = vlog2.f32 %v118_v28 }
 0x203   :  { %v120_v29 = vpop.xlane.xlu1 %119  ;;  %v142_v32 = vpop.xlane.xlu0 %141 }
 0x204   :  { %199 = vlog2.f32 %v120_v29 }
 0x207   :  { %v144_v38 = vpop.xlane.xlu0 %143 }
 0x20d   :  { %v198_v30 = vpop.eup %197 }
 0x20e   :  { %v122_v31 = vmul.f32 0.6931472, %v198_v30 }
 0x210   :  { %v125_v33 = vadd.f32 %v122_v31, %v108_v14 }
 0x211   :  { %v200_v34 = vpop.eup %199 }
 0x212   :  { %v124_v35 = vmul.f32 0.6931472, %v200_v34  ;;  %v154_v36 = vsub.f32 %v125_v33, %v142_v32 }
 0x214   :  { %159 = vst.msk [vmem:[%s282_s4] sm:$0xff] %vm158_vm4, %v154_v36  ;;  %v126_v37 = vadd.f32 %v124_v35, %v110_v17 }
 0x216   :  { %v155_v39 = vsub.f32 %v126_v37, %v144_v38 }
 0x218   :  { %160 = vst.msk [vmem:[%s282_s4 + $0x8] sm:$0xff] %vm158_vm4, %v155_v39 }
 0x219   :  { %165 = vsyncpa [#allocation3], 1 }

</bundles_post_ra>
